<compile_context>
chip_gen: v7x
topology: tpu7x:2x2x1
jax: 0.10.0
libtpu: 0.0.40
codegen_flags: <defaults>
</compile_context>

<pallas_src>
import functools

import jax
import jax.numpy as jnp
from jax.experimental import pallas as pl
from jax.experimental.pallas import tpu as pltpu

_SUBLANE = 8
_LANE = 128


def _round_up(x, m):
    return (x + m - 1) // m * m


# ---------------------------------------------------------------------------
# Kernel 1: hoisted batched input projection  xproj = X @ W_x + b
# (all timesteps at once -> large M for the MXU, outside the recurrence)
# ---------------------------------------------------------------------------
def _xproj_kernel(x_ref, w_ref, b_ref, o_ref):
    o_ref[...] = (
        jnp.dot(x_ref[...], w_ref[...], preferred_element_type=jnp.float32)
        + b_ref[...]
    )


# ---------------------------------------------------------------------------
# Kernel 2: fused recurrence over T steps (grid axis = time, "arbitrary").
#   g_t   = xproj_t + h_{t-1} @ W_h       (single fused dot; W_h covers H+O)
#   h_t   = tanh(g_t[:, :H])              (kept resident in VMEM scratch)
#   out_t = [tanh slot | linear slot | 0]  -> one lane-dense (B_pad, F_pad) store
# ---------------------------------------------------------------------------
def _rnn_seq_kernel(xproj_ref, w_h_ref, h0_ref, out_ref, h_state,
                    *, hidden_size, output_size):
    t = pl.program_id(0)

    @pl.when(t == 0)
    def _():
        h_state[...] = h0_ref[...]

    g = xproj_ref[0] + jnp.dot(
        h_state[...], w_h_ref[...], preferred_element_type=jnp.float32
    )

    col = jax.lax.broadcasted_iota(jnp.int32, g.shape, 1)
    h_new = jnp.where(col < hidden_size, jnp.tanh(g), 0.0)          # hidden slot
    o_part = jnp.where(
        (col >= hidden_size) & (col < hidden_size + output_size), g, 0.0
    )                                                               # output slot

    h_state[...] = h_new
    out_ref[0] = h_new + o_part


# ---------------------------------------------------------------------------
# One-time parameter preparation (transpose, fuse i2h/i2o, split, pad).
# ---------------------------------------------------------------------------
def prepare_params(w_i2h, b_i2h, w_i2o, b_i2o, input_size):
    H = w_i2h.shape[0]
    O = w_i2o.shape[0]
    I = input_size
    F = H + O
    F_pad = _round_up(F, _LANE)

    # Fused (in_features, out_features) weight; columns = [hidden | output].
    w_t = jnp.concatenate([w_i2h.T, w_i2o.T], axis=1).astype(jnp.float32)  # (I+H, F)
    b = jnp.concatenate([b_i2h, b_i2o]).astype(jnp.float32)                # (F,)

    w_x = jnp.zeros((I, F_pad), jnp.float32).at[:, :F].set(w_t[:I])        # input block
    w_h = jnp.zeros((F_pad, F_pad), jnp.float32).at[:H, :F].set(w_t[I:])   # recurrent block
    b_row = jnp.zeros((1, F_pad), jnp.float32).at[0, :F].set(b)
    return w_x, w_h, b_row


# ---------------------------------------------------------------------------
# Fused-sequence driver: one pallas_call for the whole recurrence.
# ---------------------------------------------------------------------------
@jax.jit
def rnn_sequence(x_seq, h0, w_i2h, b_i2h, w_i2o, b_i2o):
    """x_seq: (T, B, I), h0: (B, H) -> (outputs (T, B, O), hiddens (T, B, H))."""
    T, B, I = x_seq.shape
    H = w_i2h.shape[0]
    O = w_i2o.shape[0]
    F = H + O
    B_pad = _round_up(B, _SUBLANE)
    F_pad = _round_up(F, _LANE)

    w_x, w_h, b_row = prepare_params(w_i2h, b_i2h, w_i2o, b_i2o, I)

    # --- hoisted x-projection: one (T*B_pad, I) @ (I, F_pad) matmul ---------
    x_pad = jnp.zeros((T, B_pad, I), jnp.float32).at[:, :B, :].set(
        x_seq.astype(jnp.float32))
    x_flat = x_pad.reshape(T * B_pad, I)
    vmem = pl.BlockSpec(memory_space=pltpu.VMEM)
    xproj = pl.pallas_call(
        _xproj_kernel,
        out_shape=jax.ShapeDtypeStruct((T * B_pad, F_pad), jnp.float32),
        in_specs=[vmem, vmem, vmem],
        out_specs=vmem,
    )(x_flat, w_x, b_row).reshape(T, B_pad, F_pad)

    # --- fused recurrence: weights + hidden state stay resident in VMEM -----
    h0_pad = jnp.zeros((B_pad, F_pad), jnp.float32).at[:B, :H].set(
        h0.astype(jnp.float32))

    out_pad = pl.pallas_call(
        functools.partial(_rnn_seq_kernel, hidden_size=H, output_size=O),
        out_shape=jax.ShapeDtypeStruct((T, B_pad, F_pad), jnp.float32),
        grid_spec=pltpu.PrefetchScalarGridSpec(
            num_scalar_prefetch=0,
            grid=(T,),
            in_specs=[
                pl.BlockSpec((1, B_pad, F_pad), lambda t: (t, 0, 0)),  # xproj_t
                pl.BlockSpec((F_pad, F_pad), lambda t: (0, 0)),        # W_h (resident)
                pl.BlockSpec((B_pad, F_pad), lambda t: (0, 0)),        # h0 (resident)
            ],
            out_specs=pl.BlockSpec((1, B_pad, F_pad), lambda t: (t, 0, 0)),
            scratch_shapes=[pltpu.VMEM((B_pad, F_pad), jnp.float32)],  # h state
        ),
        compiler_params=pltpu.CompilerParams(
            dimension_semantics=("arbitrary",)),  # time axis is sequential
    )(xproj, w_h, h0_pad)

    outputs = out_pad[:, :B, H:H + O]   # (T, B, O)
    hiddens = out_pad[:, :B, :H]        # (T, B, H); hiddens[-1] is h_T
    return outputs, hiddens


def rnn_cell(x, h, w_i2h, b_i2h, w_i2o, b_i2o):
    """Single RNN step — same semantics as the PyTorch module's forward()."""
    outputs, hiddens = rnn_sequence(x[None], h, w_i2h, b_i2h, w_i2o, b_i2o)
    return outputs[0], hiddens[0]


def init_hidden(batch, hidden_size):
    return jnp.zeros((batch, hidden_size), jnp.float32)


if __name__ == "__main__":
    B, I, H, O, T = 2, 16, 32, 8, 8

    key = jax.random.PRNGKey(0)
    k_x, k_wh, k_bh, k_wo, k_bo = jax.random.split(key, 5)

    # Deterministic PyTorch-like uniform(-1/sqrt(fan_in), 1/sqrt(fan_in)) init.
    fan_in = I + H
    bound = 1.0 / (fan_in ** 0.5)
    w_i2h = jax.random.uniform(k_wh, (H, fan_in), jnp.float32, -bound, bound)
    b_i2h = jax.random.uniform(k_bh, (H,), jnp.float32, -bound, bound)
    w_i2o = jax.random.uniform(k_wo, (O, fan_in), jnp.float32, -bound, bound)
    b_i2o = jax.random.uniform(k_bo, (O,), jnp.float32, -bound, bound)

    x_seq = jax.random.normal(k_x, (T, B, I), jnp.float32)
    h0 = init_hidden(B, H)

    # --- single-step check (exact module forward semantics) -----------------
    out1, h1 = rnn_cell(x_seq[0], h0, w_i2h, b_i2h, w_i2o, b_i2o)
    jax.block_until_ready((out1, h1))
    combined = jnp.concatenate([x_seq[0], h0], axis=1)
    ref_h1 = jnp.tanh(combined @ w_i2h.T + b_i2h)
    ref_o1 = combined @ w_i2o.T + b_i2o
    assert out1.shape == (B, O) and h1.shape == (B, H)
    assert jnp.allclose(out1, ref_o1, atol=1e-5), "single-step output mismatch"
    assert jnp.allclose(h1, ref_h1, atol=1e-5), "single-step hidden mismatch"

    # --- fused-sequence check ------------------------------------------------
    outs, hids = rnn_sequence(x_seq, h0, w_i2h, b_i2h, w_i2o, b_i2o)
    jax.block_until_ready((outs, hids))

    ref_outs = []
    ref_h = h0
    for t in range(T):
        c = jnp.concatenate([x_seq[t], ref_h], axis=1)
        ref_outs.append(c @ w_i2o.T + b_i2o)       # output uses h_{t-1}
        ref_h = jnp.tanh(c @ w_i2h.T + b_i2h)      # then update hidden
    ref_outs = jnp.stack(ref_outs)

    assert outs.shape == (T, B, O) and hids.shape == (T, B, H)
    assert jnp.allclose(outs, ref_outs, atol=1e-4), "sequence output mismatch"
    assert jnp.allclose(hids[-1], ref_h, atol=1e-4), "final hidden mismatch"

    print("KERNEL_OK")
</pallas_src>

<mosaic_0001>
module attributes {stable_mosaic.version = 11 : i64} {
  func.func @_xproj_kernel(%arg0: memref<8x16xf32, #tpu.memory_space<vmem>>, %arg1: memref<16x128xf32, #tpu.memory_space<vmem>>, %arg2: memref<1x128xf32, #tpu.memory_space<vmem>>, %arg3: memref<8x128xf32, #tpu.memory_space<vmem>>) attributes {dimension_semantics = [], scalar_prefetch = 0 : i64, scratch_operands = 0 : i64, tpu.core_type = #tpu.core_type<tc>} {
    %c0 = arith.constant 0 : index
    %c0_0 = arith.constant 0 : index
    %0 = vector.load %arg0[%c0, %c0_0] : memref<8x16xf32, #tpu.memory_space<vmem>>, vector<8x16xf32>
    %c0_1 = arith.constant 0 : index
    %c0_2 = arith.constant 0 : index
    %1 = vector.load %arg1[%c0_1, %c0_2] : memref<16x128xf32, #tpu.memory_space<vmem>>, vector<16x128xf32>
    %cst = arith.constant dense<0.000000e+00> : vector<8x128xf32>
    %2 = tpu.matmul %0, %1, %cst {dimension_numbers = #tpu.dot_dimension_numbers<[1], [0], [0], [1], [0, 0, 1, 1], [], []>} : vector<8x16xf32>, vector<16x128xf32>, vector<8x128xf32> -> vector<8x128xf32>
    %c0_3 = arith.constant 0 : index
    %c0_4 = arith.constant 0 : index
    %3 = vector.load %arg2[%c0_3, %c0_4] : memref<1x128xf32, #tpu.memory_space<vmem>>, vector<1x128xf32>
    %4 = vector.broadcast %3 : vector<1x128xf32> to vector<8x128xf32>
    %5 = arith.addf %2, %4 : vector<8x128xf32>
    %c0_5 = arith.constant 0 : index
    %c0_6 = arith.constant 0 : index
    %6 = vector.load %arg3[%c0_5, %c0_6] : memref<8x128xf32, #tpu.memory_space<vmem>>, vector<8x128xf32>
    tpu.vector_store %arg3[%c0_5, %c0_6], %5 {strides = array<i32>} : memref<8x128xf32, #tpu.memory_space<vmem>>, vector<8x128xf32>,
    return
  }
}

module attributes {stable_mosaic.version = 11 : i64} {
  func.func @_rnn_seq_kernel(%arg0: i32, %arg1: memref<1x8x128xf32, #tpu.memory_space<vmem>>, %arg2: memref<128x128xf32, #tpu.memory_space<vmem>>, %arg3: memref<8x128xf32, #tpu.memory_space<vmem>>, %arg4: memref<1x8x128xf32, #tpu.memory_space<vmem>>, %arg5: memref<8x128xf32, #tpu.memory_space<vmem>>) attributes {dimension_semantics = [#tpu.dimension_semantics<arbitrary>], iteration_bounds = array<i64: 1>, scalar_prefetch = 0 : i64, scratch_operands = 1 : i64, tpu.core_type = #tpu.core_type<tc>, window_params = [{transform_indices = @transform_0, window_bounds = array<i64: 1, 8, 128>}, {pipeline_mode = #tpu.pipeline_mode<synchronous>, transform_indices = @transform_1, window_bounds = array<i64: 128, 128>}, {pipeline_mode = #tpu.pipeline_mode<synchronous>, transform_indices = @transform_2, window_bounds = array<i64: 8, 128>}, {transform_indices = @transform_3, window_bounds = array<i64: 1, 8, 128>}]} {
    %c0_i32 = arith.constant 0 : i32
    %0 = arith.cmpi eq, %arg0, %c0_i32 : i32
    %1 = arith.extui %0 : i1 to i32
    %c0_i32_0 = arith.constant 0 : i32
    %2 = arith.cmpi ne, %1, %c0_i32_0 : i32
    scf.if %2 {
      %c0_15 = arith.constant 0 : index
      %c0_16 = arith.constant 0 : index
      %27 = vector.load %arg3[%c0_15, %c0_16] : memref<8x128xf32, #tpu.memory_space<vmem>>, vector<8x128xf32>
      %c0_17 = arith.constant 0 : index
      %c0_18 = arith.constant 0 : index
      %28 = vector.load %arg5[%c0_17, %c0_18] : memref<8x128xf32, #tpu.memory_space<vmem>>, vector<8x128xf32>
      tpu.vector_store %arg5[%c0_17, %c0_18], %27 {strides = array<i32>} : memref<8x128xf32, #tpu.memory_space<vmem>>, vector<8x128xf32>,
    } else {
    }
    %c0 = arith.constant 0 : index
    %c0_1 = arith.constant 0 : index
    %c0_2 = arith.constant 0 : index
    %3 = vector.load %arg1[%c0, %c0_1, %c0_2] : memref<1x8x128xf32, #tpu.memory_space<vmem>>, vector<1x8x128xf32>
    %4 = vector.shape_cast %3 : vector<1x8x128xf32> to vector<8x128xf32>
    %c0_3 = arith.constant 0 : index
    %c0_4 = arith.constant 0 : index
    %5 = vector.load %arg5[%c0_3, %c0_4] : memref<8x128xf32, #tpu.memory_space<vmem>>, vector<8x128xf32>
    %c0_5 = arith.constant 0 : index
    %c0_6 = arith.constant 0 : index
    %6 = vector.load %arg2[%c0_5, %c0_6] : memref<128x128xf32, #tpu.memory_space<vmem>>, vector<128x128xf32>
    %cst = arith.constant dense<0.000000e+00> : vector<8x128xf32>
    %7 = tpu.matmul %5, %6, %cst {dimension_numbers = #tpu.dot_dimension_numbers<[1], [0], [0], [1], [0, 0, 1, 1], [], []>} : vector<8x128xf32>, vector<128x128xf32>, vector<8x128xf32> -> vector<8x128xf32>
    %8 = arith.addf %4, %7 : vector<8x128xf32>
    %9 = tpu.iota {dimensions = array<i32: 1>} : vector<8x128xi32>
    %c32_i32 = arith.constant 32 : i32
    %10 = vector.broadcast %c32_i32 : i32 to vector<8x128xi32>
    %11 = arith.cmpi slt, %9, %10 : vector<8x128xi32>
    %12 = math.tanh %8 : vector<8x128xf32>
    %cst_7 = arith.constant 0.000000e+00 : f32
    %13 = vector.broadcast %cst_7 : f32 to vector<8x128xf32>
    %14 = arith.select %11, %12, %13 : vector<8x128xi1>, vector<8x128xf32>
    %c32_i32_8 = arith.constant 32 : i32
    %15 = vector.broadcast %c32_i32_8 : i32 to vector<8x128xi32>
    %16 = arith.cmpi sge, %9, %15 : vector<8x128xi32>
    %c40_i32 = arith.constant 40 : i32
    %17 = vector.broadcast %c40_i32 : i32 to vector<8x128xi32>
    %18 = arith.cmpi slt, %9, %17 : vector<8x128xi32>
    %19 = arith.andi %16, %18 : vector<8x128xi1>
    %cst_9 = arith.constant 0.000000e+00 : f32
    %20 = vector.broadcast %cst_9 : f32 to vector<8x128xf32>
    %21 = arith.select %19, %8, %20 : vector<8x128xi1>, vector<8x128xf32>
    %c0_10 = arith.constant 0 : index
    %c0_11 = arith.constant 0 : index
    %22 = vector.load %arg5[%c0_10, %c0_11] : memref<8x128xf32, #tpu.memory_space<vmem>>, vector<8x128xf32>
    tpu.vector_store %arg5[%c0_10, %c0_11], %14 {strides = array<i32>} : memref<8x128xf32, #tpu.memory_space<vmem>>, vector<8x128xf32>,
    %23 = arith.addf %14, %21 : vector<8x128xf32>
    %c0_12 = arith.constant 0 : index
    %c0_13 = arith.constant 0 : index
    %c0_14 = arith.constant 0 : index
    %24 = vector.load %arg4[%c0_12, %c0_13, %c0_14] : memref<1x8x128xf32, #tpu.memory_space<vmem>>, vector<1x8x128xf32>
    %25 = vector.shape_cast %24 : vector<1x8x128xf32> to vector<8x128xf32>
    %26 = vector.shape_cast %23 : vector<8x128xf32> to vector<1x8x128xf32>
    tpu.vector_store %arg4[%c0_12, %c0_13, %c0_14], %26 {strides = array<i32>} : memref<1x8x128xf32, #tpu.memory_space<vmem>>, vector<1x8x128xf32>,
    return
  }
  func.func @transform_0(%arg0: i32) -> (i32, i32, i32) {
    %c0_i32 = arith.constant 0 : i32
    %c0_i32_0 = arith.constant 0 : i32
    %c0_i32_1 = arith.constant 0 : i32
    return %arg0, %c0_i32, %c0_i32_0 : i32, i32, i32
  }
  func.func @transform_1(%arg0: i32) -> (i32, i32) {
    %c0_i32 = arith.constant 0 : i32
    %c0_i32_0 = arith.constant 0 : i32
    %c0_i32_1 = arith.constant 0 : i32
    return %c0_i32, %c0_i32_0 : i32, i32
  }
  func.func @transform_2(%arg0: i32) -> (i32, i32) {
    %c0_i32 = arith.constant 0 : i32
    %c0_i32_0 = arith.constant 0 : i32
    %c0_i32_1 = arith.constant 0 : i32
    return %c0_i32, %c0_i32_0 : i32, i32
  }
  func.func @transform_3(%arg0: i32) -> (i32, i32, i32) {
    %c0_i32 = arith.constant 0 : i32
    %c0_i32_0 = arith.constant 0 : i32
    %c0_i32_1 = arith.constant 0 : i32
    return %arg0, %c0_i32, %c0_i32_0 : i32, i32, i32
  }
}

</mosaic_0001>

<bundles_post_ra>
// kernel: rnn_sequence.2
= control target key start
LH: loop header
LB: loop body
LE: loop exit
PB: predicated region body
PF: predicated region fallthrough
CT: control target
= control target key end

     0   :  { %v121_v0 = vmov 0.0|0.0   ;;  %vm122_vm0 = vmmov 0   ;;  %v123_v3 = vmov 0.0   ;;  %vm24_vm1 = vcmask 130048   ;;  %s159_s1 = inlined_call_operand.vmem [shape: f32[16,128], index: 1, kind: input, shape index: {}]   ;;  %s160_s0 = inlined_call_operand.vmem [shape: f32[8,16], index: 0, kind: input, shape index: {}]   ;;  %s161_s2 = inlined_call_operand.vmem [shape: f32[1,128], index: 2, kind: input, shape index: {}]   ;;  %s162_s3 = inlined_call_operand.vmem [shape: f32[8,128], index: 3, kind: output, shape index: {}]  }
   0x1   :  { %115 = vmatprep.subr.bf16.mxu0 %v121_v0  ;;  %v15_v1 = vld [vmem:[%s159_s1] sm:$0xff]  ;;  %v16_v2 = vld [vmem:[%s159_s1 + $0x8] sm:$0xff]  ;;  %112 = vmatprep.mubr.msk.f32.mxu0 %vm122_vm0, %v123_v3 }
   0x2   :  { %v116_v4 = vpack.c.bf16 %v16_v2, %v15_v1  ;;  %v14_v5 = vld [vmem:[%s160_s0] sm:$0xff] }
   0x3   :  { %v103_v6 = vld [vmem:[%s161_s2] ss:$0 sm:$0xff] }
   0x4   :  { %117 = vmatpush3.bf16.msra.mxu0 %v116_v4 }
   0x7   :  { %113 = vmatmul.mubr.msk.f32.vlgmr.msra.gmra.mrb[0].mxu0 %vm24_vm1, %v14_v5 }
  0xda   :  { %v94_v7 = vpop.f32.mrb[0].mxu0 }
  0xdb   :  { %v95_v8 = vadd.f32 %v103_v6, %v94_v7  ;;  %v114_v9 = vpop.f32.mrb[1].mxu0 }
  0xdd   :  { %98 = vst [vmem:[%s162_s3] sm:$0xff] %v95_v8 }

// kernel: rnn_sequence.3
= control target key start
LH: loop header
LB: loop body
LE: loop exit
PB: predicated region body
PF: predicated region fallthrough
CT: control target
= control target key end

     0   :  { %v206_v0 = vmov 0.0|0.0   ;;  %vm207_vm0 = vmmov 0   ;;  %v208_v4 = vmov 0.0   ;;  %v109_v29 = vlaneseq  ;;  %s286_s1 = inlined_call_operand.vmem [shape: f32[128,128], index: 1, kind: input, shape index: {}]   ;;  %s287_s2 = inlined_call_operand.vmem [shape: f32[8,128], index: 2, kind: input, shape index: {}]   ;;  %s288_s0 = inlined_call_operand.vmem [shape: f32[1,8,128], index: 0, kind: input, shape index: {}]   ;;  %s289_s3 = inlined_call_operand.vmem [shape: f32[1,8,128], index: 3, kind: output, shape index: {}]  }
   0x1   :  { %177 = vmatprep.subr.bf16.mxu0 %v206_v0  ;;  %v22_v1 = vld [vmem:[%s286_s1] sm:$0xff]  ;;  %v23_v2 = vld [vmem:[%s286_s1 + $0x8] sm:$0xff]  ;;  %v24_v3 = vld [vmem:[%s286_s1 + $0x10] sm:$0xff]  ;;  %174 = vmatprep.mubr.msk.f32.mxu0 %vm207_vm0, %v208_v4 }
   0x2   :  { %v178_v5 = vpack.c.bf16 %v23_v2, %v22_v1  ;;  %v25_v6 = vld [vmem:[%s286_s1 + $0x18] sm:$0xff]  ;;  %v26_v8 = vld [vmem:[%s286_s1 + $0x20] sm:$0xff]  ;;  %v27_v9 = vld [vmem:[%s286_s1 + $0x28] sm:$0xff]  ;;  %v110_v32 = vand.u32 127, %v109_v29 }
   0x3   :  { %v181_v7 = vpack.c.bf16 %v25_v6, %v24_v3  ;;  %v184_v10 = vpack.c.bf16 %v27_v9, %v26_v8  ;;  %v28_v11 = vld [vmem:[%s286_s1 + $0x30] sm:$0xff]  ;;  %v29_v12 = vld [vmem:[%s286_s1 + $0x38] sm:$0xff]  ;;  %v30_v14 = vld [vmem:[%s286_s1 + $0x40] sm:$0xff] }
   0x4   :  { %179 = vmatpush3.bf16.msra.mxu0 %v178_v5  ;;  %v187_v13 = vpack.c.bf16 %v29_v12, %v28_v11  ;;  %v31_v15 = vld [vmem:[%s286_s1 + $0x48] sm:$0xff]  ;;  %v32_v17 = vld [vmem:[%s286_s1 + $0x50] sm:$0xff]  ;;  %v33_v18 = vld [vmem:[%s286_s1 + $0x58] sm:$0xff]  ;;  %vm114_vm1 = vcmp.ge.s32.totalorder %v110_v32, 32  ;;  %vm115_vm2 = vcmp.lt.s32.totalorder %v110_v32, 40  ;;  %vm111_vm3 = vcmp.lt.s32.totalorder %v110_v32, 32 }
   0x5   :  { %180 = vmatprep.subr.bf16.mxu0 %v206_v0  ;;  %v190_v16 = vpack.c.bf16 %v31_v15, %v30_v14  ;;  %v193_v19 = vpack.c.bf16 %v33_v18, %v32_v17  ;;  %v34_v20 = vld [vmem:[%s286_s1 + $0x60] sm:$0xff]  ;;  %v35_v21 = vld [vmem:[%s286_s1 + $0x68] sm:$0xff]  ;;  %v36_v23 = vld [vmem:[%s286_s1 + $0x70] sm:$0xff] }
   0x6   :  { %v196_v22 = vpack.c.bf16 %v35_v21, %v34_v20  ;;  %v37_v24 = vld [vmem:[%s286_s1 + $0x78] sm:$0xff]  ;;  %v18_v26 = vld [vmem:[%s287_s2] sm:$0xff]  ;;  %vm116_vm4 = vmand %vm114_vm1, %vm115_vm2 }
   0x7   :  { %v199_v25 = vpack.c.bf16 %v37_v24, %v36_v23  ;;  %v20_v27 = vld [vmem:[%s288_s0] sm:$0xff] }
   0x8   :  { %182 = vmatpush3.bf16.msra.mxu0 %v181_v7 }
   0x9   :  { %183 = vmatprep.subr.bf16.mxu0 %v206_v0 }
   0xc   :  { %185 = vmatpush3.bf16.msra.mxu0 %v184_v10 }
   0xd   :  { %186 = vmatprep.subr.bf16.mxu0 %v206_v0 }
  0x10   :  { %188 = vmatpush3.bf16.msra.mxu0 %v187_v13 }
  0x11   :  { %189 = vmatprep.subr.bf16.mxu0 %v206_v0 }
  0x14   :  { %191 = vmatpush3.bf16.msra.mxu0 %v190_v16 }
  0x15   :  { %192 = vmatprep.subr.bf16.mxu0 %v206_v0 }
  0x18   :  { %194 = vmatpush3.bf16.msra.mxu0 %v193_v19 }
  0x19   :  { %195 = vmatprep.subr.bf16.mxu0 %v206_v0 }
  0x1c   :  { %197 = vmatpush3.bf16.msra.mxu0 %v196_v22 }
  0x1d   :  { %198 = vmatprep.subr.bf16.mxu0 %v206_v0 }
  0x20   :  { %200 = vmatpush3.bf16.msra.mxu0 %v199_v25 }
  0x23   :  { %175 = vmatmul.mubr.f32.vlgmr.msra.gmra.mrb[0].mxu0 %v18_v26 }
  0xf6   :  { %v104_v28 = vpop.f32.mrb[0].mxu0 }
  0xf7   :  { %v108_v30 = vadd.f32 %v104_v28, %v20_v27  ;;  %v176_v31 = vpop.f32.mrb[1].mxu0 }
  0xf9   :  { %204 = vtanh.f32 %v108_v30  ;;  %v117_v35 = vsel %vm116_vm4, %v108_v30, 0.0 }
 0x103   :  { %v205_v33 = vpop.eup %204 }
 0x104   :  { %v113_v34 = vsel %vm111_vm3, %v205_v33, 0.0 }
 0x105   :  { %v119_v36 = vadd.f32 %v117_v35, %v113_v34 }
 0x107   :  { %120 = vst [vmem:[%s289_s3] sm:$0xff] %v119_v36 }

</bundles_post_ra>
